<compile_context>
chip_gen: v5e
topology: v5e:2x2
jax: 0.10.0
libtpu: 0.0.40
codegen_flags: <defaults>
</compile_context>

<pallas_src>
import jax
import jax.numpy as jnp
from jax.experimental import pallas as pl
from jax.experimental.pallas import tpu as pltpu

# Deterministic "hparams" (Critic has no learnable weights).
ALPHA = 0.1    # hparams['kld_loss_scale']
BETA = 0.25    # hparams['perm_loss_scale']
GAMMA = 0.5    # hparams['property_loss_scale']
VAE = True     # hparams['vae']


def _cdiv(a, b):
    return -(-a // b)


def _rup(x, m=128):
    return _cdiv(x, m) * m


def _device_budgets():
    """(double-buffered working-set target, vmem_limit_bytes) per generation."""
    try:
        kind = jax.devices()[0].device_kind.lower()
    except Exception:
        kind = ""
    if (not kind) or ("v7" in kind) or ("7x" in kind):
        # v7x: 64 MiB physical VMEM per TensorCore -> stay under the scoped default.
        return 24 << 20, 30 << 20
    # v5e / v6e: 128 MiB VMEM -> use a large double-buffered working set.
    return 44 << 20, 64 << 20


def critic_forward(mask, nodes_true, nodes_pred, perm,
                   props_true, props_pred, mu, logvar):
    B, N, F = nodes_true.shape
    P = props_true.shape[-1]
    D = mu.shape[-1]
    NF, NN = N * F, N * N

    if mask.dtype == jnp.bool_:
        mask = mask.astype(jnp.float32)

    # Lane-dense flattening of the big streams (contiguous reshape -> free).
    nt2 = nodes_true.reshape(B, NF)
    np2 = nodes_pred.reshape(B, NF)
    perm2 = perm.reshape(B, NN)

    # ---- padding-aware per-row VMEM cost (round every last dim up to 128 lanes) ----
    in_row_bytes = (_rup(N) * mask.dtype.itemsize
                    + _rup(NF) * (nt2.dtype.itemsize + np2.dtype.itemsize)
                    + _rup(NN) * perm2.dtype.itemsize
                    + _rup(P) * (props_true.dtype.itemsize + props_pred.dtype.itemsize)
                    + _rup(D) * (mu.dtype.itemsize + logvar.dtype.itemsize)
                    + _rup(1) * 4)                                   # validity column
    tmp_row_bytes = 3 * (_rup(NF) + _rup(NN)) * 4                    # f32 temporaries
    per_row_cost = 2 * in_row_bytes + tmp_row_bytes                  # 2x: double buffer

    working_set, vmem_cap = _device_budgets()

    # ---- tiling: (splits parallel) x (steps arbitrary) x (tb rows per step) ----
    splits = 2 if (B % 2 == 0 and B >= 16) else 1
    if splits == 1 and B * per_row_cost <= working_set:
        tb, steps, B_pad = B, 1, B                                   # no-pad fast path
    else:
        max_tb = max(8, (working_set // per_row_cost) // 8 * 8)
        rows_per_split = _cdiv(B, splits)
        steps = max(1, _cdiv(rows_per_split, max_tb))
        tb = _cdiv(_cdiv(rows_per_split, steps), 8) * 8
        B_pad = splits * steps * tb

    pad = B_pad - B
    if pad:
        pad_rows = lambda a: jnp.pad(a, ((0, pad), (0, 0)))
        mask, nt2, np2, perm2 = map(pad_rows, (mask, nt2, np2, perm2))
        props_true, props_pred = pad_rows(props_true), pad_rows(props_pred)
        mu, logvar = pad_rows(mu), pad_rows(logvar)
    # validity column zeroes the perm-entropy contribution of padded rows
    # (all other terms are exactly zero for zero-padded rows).
    valid = (jnp.arange(B_pad) < B).astype(jnp.float32).reshape(B_pad, 1)

    def kernel(mask_ref, nt_ref, np_ref, perm_ref, pt_ref, pp_ref, mu_ref, lv_ref,
               valid_ref, out_ref, acc_node, acc_mask, acc_perm, acc_prop, acc_kld):
        step = pl.program_id(1)
        f32 = jnp.float32

        @pl.when(step == 0)
        def _init():
            acc_node[...] = jnp.zeros_like(acc_node)
            acc_mask[...] = jnp.zeros_like(acc_mask)
            acc_perm[...] = jnp.zeros_like(acc_perm)
            acc_prop[...] = jnp.zeros_like(acc_prop)
            acc_kld[...] = jnp.zeros_like(acc_kld)

        # ---- GraphReconstructionLoss: masked node MSE on lane-dense (tb, N*F) ----
        m = mask_ref[...].astype(f32)                                  # (tb, N)
        d = np_ref[...].astype(f32) - nt_ref[...].astype(f32)          # (tb, N*F)
        # Expand the mask along F with no reshape: m_exp = m @ E, where
        # E[n, j] = 1 iff lane j belongs to node n (j in [n*F, (n+1)*F)).
        n_idx = jax.lax.broadcasted_iota(jnp.int32, (N, NF), 0)
        j_idx = jax.lax.broadcasted_iota(jnp.int32, (N, NF), 1)
        expand = ((j_idx >= n_idx * F) & (j_idx < (n_idx + 1) * F)).astype(f32)
        m_exp = jnp.dot(m, expand, preferred_element_type=f32)         # (tb, N*F)
        acc_node[...] += jnp.sum(d * d * m_exp, axis=0, keepdims=True)
        acc_mask[...] += jnp.sum(m, axis=0, keepdims=True)

        # ---- PermutaionMatrixPenalty, collapsed to -2*sum(p*log p)/(B*N) ----------
        # clamp_min(log p, -100) of the reference is dead: p >= 1e-7 -> log p >= -16.2
        p = perm_ref[...].astype(f32) + f32(1e-7)
        # TODO(synk): if the bundle dump shows the single EUP binding on v7x after the
        # bandwidth fixes, evaluate p*log(p) in bf16 instead of f32.
        plogp = p * jnp.log(p) * valid_ref[...]                        # zero padded rows
        acc_perm[...] += jnp.sum(plogp, axis=0, keepdims=True)

        # ---- PropertyLoss: plain MSE -----------------------------------------------
        pd = pp_ref[...].astype(f32) - pt_ref[...].astype(f32)
        acc_prop[...] += jnp.sum(pd * pd, axis=0, keepdims=True)

        # ---- KLDLoss ------------------------------------------------------------------
        muv = mu_ref[...].astype(f32)
        lv = lv_ref[...].astype(f32)
        acc_kld[...] += jnp.sum(-0.5 * (1.0 + lv - muv * muv - jnp.exp(lv)),
                                axis=0, keepdims=True)

        @pl.when(step == pl.num_programs(1) - 1)
        def _finalize():
            # Raw per-core partial sums only: normalization (divisions by counts) is
            # done in the wrapper so the multi-core split stays correct.
            out_ref[0, 0] = jnp.sum(acc_node[...])
            out_ref[0, 1] = jnp.sum(acc_mask[...])
            out_ref[0, 2] = jnp.sum(acc_perm[...])
            out_ref[0, 3] = jnp.sum(acc_prop[...])
            out_ref[0, 4] = jnp.sum(acc_kld[...])
            out_ref[0, 5] = f32(0.0)
            out_ref[0, 6] = f32(0.0)
            out_ref[0, 7] = f32(0.0)

    bmap = lambda c, i: (c * steps + i, 0)
    # TODO(synk): coalesce the small per-row streams (mask/props/mu/logvar/valid) into
    # one lane-padded array to cut per-step DMA descriptors from 9 to ~4.
    grid_spec = pltpu.PrefetchScalarGridSpec(
        num_scalar_prefetch=0,
        grid=(splits, steps),
        in_specs=[
            pl.BlockSpec((tb, N), bmap),    # mask
            pl.BlockSpec((tb, NF), bmap),   # nodes_true (lane-dense)
            pl.BlockSpec((tb, NF), bmap),   # nodes_pred (lane-dense)
            pl.BlockSpec((tb, NN), bmap),   # perm (lane-dense)
            pl.BlockSpec((tb, P), bmap),    # props_true
            pl.BlockSpec((tb, P), bmap),    # props_pred
            pl.BlockSpec((tb, D), bmap),    # mu
            pl.BlockSpec((tb, D), bmap),    # logvar
            pl.BlockSpec((tb, 1), bmap),    # row validity (for padded batch rows)
        ],
        out_specs=pl.BlockSpec((1, 8), lambda c, i: (c, 0),
                               memory_space=pltpu.MemorySpace.SMEM),
        scratch_shapes=[
            pltpu.VMEM((1, NF), jnp.float32),   # node SSE lane-partials
            pltpu.VMEM((1, N), jnp.float32),    # mask-count lane-partials
            pltpu.VMEM((1, NN), jnp.float32),   # perm p*log(p) lane-partials
            pltpu.VMEM((1, P), jnp.float32),    # property SSE lane-partials
            pltpu.VMEM((1, D), jnp.float32),    # KLD lane-partials
        ],
    )

    out = pl.pallas_call(
        kernel,
        out_shape=jax.ShapeDtypeStruct((splits, 8), jnp.float32),
        grid_spec=grid_spec,
        compiler_params=pltpu.CompilerParams(
            dimension_semantics=("parallel", "arbitrary"),
            vmem_limit_bytes=int(vmem_cap),
        ),
    )(mask, nt2, np2, perm2, props_true, props_pred, mu, logvar, valid)

    # ---- wrapper finalization (cheap scalar ops; required for the core split) ------
    parts = jnp.sum(out, axis=0)
    node_loss = parts[0] / (parts[1] * F)
    perm_loss = (-2.0 / (B * N)) * parts[2]
    property_loss = parts[3] / (B * P)
    kld_loss = parts[4] / B
    total = node_loss + BETA * perm_loss + GAMMA * property_loss
    if VAE:
        total = total + ALPHA * kld_loss

    losses = {
        "node_loss": node_loss,
        "perm_loss": perm_loss,
        "property_loss": property_loss,
        "loss": total,
    }
    if VAE:
        losses["kld_loss"] = kld_loss
    return losses


def _reference(mask, nodes_true, nodes_pred, perm, props_true, props_pred, mu, logvar):
    m = mask.astype(jnp.float32)
    feat = nodes_true.shape[-1]
    node_loss = jnp.sum(((nodes_pred - nodes_true) ** 2) * m[:, :, None]) / (
        jnp.sum(m) * feat)
    p = perm + 1e-7
    plogp = p * jnp.maximum(jnp.log(p), -100.0)
    perm_loss = jnp.mean(-jnp.sum(plogp, axis=1)) + jnp.mean(-jnp.sum(plogp, axis=2))
    property_loss = jnp.mean((props_pred - props_true) ** 2)
    kld_loss = jnp.mean(-0.5 * jnp.sum(1 + logvar - mu ** 2 - jnp.exp(logvar), axis=1))
    total = node_loss + BETA * perm_loss + GAMMA * property_loss
    if VAE:
        total = total + ALPHA * kld_loss
    return {"node_loss": node_loss, "perm_loss": perm_loss,
            "property_loss": property_loss, "kld_loss": kld_loss, "loss": total}


if __name__ == "__main__":
    B, N, F, P, D = 2, 8, 16, 4, 32
    key = jax.random.PRNGKey(0)
    k1, k2, k3, k4, k5, k6, k7 = jax.random.split(key, 7)

    # deterministic node-count mask: graph 0 has 6 real nodes, graph 1 has 5
    lengths = jnp.array([6, 5], dtype=jnp.int32)
    mask = (jnp.arange(N)[None, :] < lengths[:, None]).astype(jnp.float32)

    nodes_true = jax.random.normal(k1, (B, N, F), dtype=jnp.float32)
    nodes_pred = jax.random.normal(k2, (B, N, F), dtype=jnp.float32)
    perm = jax.nn.softmax(jax.random.normal(k3, (B, N, N), dtype=jnp.float32), axis=-1)
    props_true = jax.random.normal(k4, (B, P), dtype=jnp.float32)
    props_pred = jax.random.normal(k5, (B, P), dtype=jnp.float32)
    mu = jax.random.normal(k6, (B, D), dtype=jnp.float32)
    logvar = 0.1 * jax.random.normal(k7, (B, D), dtype=jnp.float32)

    losses = critic_forward(mask, nodes_true, nodes_pred, perm,
                            props_true, props_pred, mu, logvar)
    losses = jax.tree_util.tree_map(jax.block_until_ready, losses)

    ref = _reference(mask, nodes_true, nodes_pred, perm,
                     props_true, props_pred, mu, logvar)
    for k in losses:
        assert jnp.allclose(losses[k], ref[k], rtol=1e-5, atol=1e-5), (
            f"mismatch in {k}: {losses[k]} vs {ref[k]}")

    print("KERNEL_OK")
</pallas_src>

<mosaic_0001>
module attributes {stable_mosaic.version = 11 : i64} {
  func.func @kernel(%arg0: i32, %arg1: i32, %arg2: memref<2x8xf32, #tpu.memory_space<vmem>>, %arg3: memref<2x128xf32, #tpu.memory_space<vmem>>, %arg4: memref<2x128xf32, #tpu.memory_space<vmem>>, %arg5: memref<2x64xf32, #tpu.memory_space<vmem>>, %arg6: memref<2x4xf32, #tpu.memory_space<vmem>>, %arg7: memref<2x4xf32, #tpu.memory_space<vmem>>, %arg8: memref<2x32xf32, #tpu.memory_space<vmem>>, %arg9: memref<2x32xf32, #tpu.memory_space<vmem>>, %arg10: memref<2x1xf32, #tpu.memory_space<vmem>>, %arg11: memref<1x8xf32, #tpu.memory_space<smem>>, %arg12: memref<1x128xf32, #tpu.memory_space<vmem>>, %arg13: memref<1x8xf32, #tpu.memory_space<vmem>>, %arg14: memref<1x64xf32, #tpu.memory_space<vmem>>, %arg15: memref<1x4xf32, #tpu.memory_space<vmem>>, %arg16: memref<1x32xf32, #tpu.memory_space<vmem>>) attributes {dimension_semantics = [#tpu.dimension_semantics<parallel>, #tpu.dimension_semantics<arbitrary>], iteration_bounds = array<i64: 1, 1>, scalar_prefetch = 0 : i64, scratch_operands = 5 : i64, tpu.core_type = #tpu.core_type<tc>, window_params = [{transform_indices = @transform_0, window_bounds = array<i64: 2, 8>}, {transform_indices = @transform_1, window_bounds = array<i64: 2, 128>}, {transform_indices = @transform_2, window_bounds = array<i64: 2, 128>}, {transform_indices = @transform_3, window_bounds = array<i64: 2, 64>}, {transform_indices = @transform_4, window_bounds = array<i64: 2, 4>}, {transform_indices = @transform_5, window_bounds = array<i64: 2, 4>}, {transform_indices = @transform_6, window_bounds = array<i64: 2, 32>}, {transform_indices = @transform_7, window_bounds = array<i64: 2, 32>}, {transform_indices = @transform_8, window_bounds = array<i64: 2, 1>}, {transform_indices = @transform_9, window_bounds = array<i64: 1, 8>}]} {
    %c0_i32 = arith.constant 0 : i32
    %0 = arith.cmpi eq, %arg1, %c0_i32 : i32
    %1 = arith.extui %0 : i1 to i32
    %c0_i32_0 = arith.constant 0 : i32
    %2 = arith.cmpi ne, %1, %c0_i32_0 : i32
    scf.if %2 {
      %cst_49 = arith.constant 0.000000e+00 : f32
      %73 = vector.broadcast %cst_49 : f32 to vector<1x128xf32>
      %c0_50 = arith.constant 0 : index
      %c0_51 = arith.constant 0 : index
      %74 = vector.load %arg12[%c0_50, %c0_51] : memref<1x128xf32, #tpu.memory_space<vmem>>, vector<1x128xf32>
      tpu.vector_store %arg12[%c0_50, %c0_51], %73 {strides = array<i32>} : memref<1x128xf32, #tpu.memory_space<vmem>>, vector<1x128xf32>,
      %cst_52 = arith.constant 0.000000e+00 : f32
      %75 = vector.broadcast %cst_52 : f32 to vector<1x8xf32>
      %c0_53 = arith.constant 0 : index
      %c0_54 = arith.constant 0 : index
      %76 = vector.load %arg13[%c0_53, %c0_54] : memref<1x8xf32, #tpu.memory_space<vmem>>, vector<1x8xf32>
      tpu.vector_store %arg13[%c0_53, %c0_54], %75 {strides = array<i32>} : memref<1x8xf32, #tpu.memory_space<vmem>>, vector<1x8xf32>,
      %cst_55 = arith.constant 0.000000e+00 : f32
      %77 = vector.broadcast %cst_55 : f32 to vector<1x64xf32>
      %c0_56 = arith.constant 0 : index
      %c0_57 = arith.constant 0 : index
      %78 = vector.load %arg14[%c0_56, %c0_57] : memref<1x64xf32, #tpu.memory_space<vmem>>, vector<1x64xf32>
      tpu.vector_store %arg14[%c0_56, %c0_57], %77 {strides = array<i32>} : memref<1x64xf32, #tpu.memory_space<vmem>>, vector<1x64xf32>,
      %cst_58 = arith.constant 0.000000e+00 : f32
      %79 = vector.broadcast %cst_58 : f32 to vector<1x4xf32>
      %c0_59 = arith.constant 0 : index
      %c0_60 = arith.constant 0 : index
      %80 = vector.load %arg15[%c0_59, %c0_60] : memref<1x4xf32, #tpu.memory_space<vmem>>, vector<1x4xf32>
      tpu.vector_store %arg15[%c0_59, %c0_60], %79 {strides = array<i32>} : memref<1x4xf32, #tpu.memory_space<vmem>>, vector<1x4xf32>,
      %cst_61 = arith.constant 0.000000e+00 : f32
      %81 = vector.broadcast %cst_61 : f32 to vector<1x32xf32>
      %c0_62 = arith.constant 0 : index
      %c0_63 = arith.constant 0 : index
      %82 = vector.load %arg16[%c0_62, %c0_63] : memref<1x32xf32, #tpu.memory_space<vmem>>, vector<1x32xf32>
      tpu.vector_store %arg16[%c0_62, %c0_63], %81 {strides = array<i32>} : memref<1x32xf32, #tpu.memory_space<vmem>>, vector<1x32xf32>,
    } else {
    }
    %c0 = arith.constant 0 : index
    %c0_1 = arith.constant 0 : index
    %3 = vector.load %arg2[%c0, %c0_1] : memref<2x8xf32, #tpu.memory_space<vmem>>, vector<2x8xf32>
    %c0_2 = arith.constant 0 : index
    %c0_3 = arith.constant 0 : index
    %4 = vector.load %arg4[%c0_2, %c0_3] : memref<2x128xf32, #tpu.memory_space<vmem>>, vector<2x128xf32>
    %c0_4 = arith.constant 0 : index
    %c0_5 = arith.constant 0 : index
    %5 = vector.load %arg3[%c0_4, %c0_5] : memref<2x128xf32, #tpu.memory_space<vmem>>, vector<2x128xf32>
    %6 = arith.subf %4, %5 : vector<2x128xf32>
    %7 = tpu.iota {dimensions = array<i32: 0>} : vector<8x128xi32>
    %8 = tpu.iota {dimensions = array<i32: 1>} : vector<8x128xi32>
    %c16_i32 = arith.constant 16 : i32
    %9 = vector.broadcast %c16_i32 : i32 to vector<8x128xi32>
    %10 = arith.muli %7, %9 : vector<8x128xi32>
    %11 = arith.cmpi sge, %8, %10 : vector<8x128xi32>
    %c1_i32 = arith.constant 1 : i32
    %12 = vector.broadcast %c1_i32 : i32 to vector<8x128xi32>
    %13 = arith.addi %7, %12 : vector<8x128xi32>
    %c16_i32_6 = arith.constant 16 : i32
    %14 = vector.broadcast %c16_i32_6 : i32 to vector<8x128xi32>
    %15 = arith.muli %13, %14 : vector<8x128xi32>
    %16 = arith.cmpi slt, %8, %15 : vector<8x128xi32>
    %17 = arith.andi %11, %16 : vector<8x128xi1>
    %18 = arith.extui %17 : vector<8x128xi1> to vector<8x128xi32>
    %19 = arith.sitofp %18 : vector<8x128xi32> to vector<8x128xf32>
    %cst = arith.constant dense<0.000000e+00> : vector<2x128xf32>
    %20 = tpu.matmul %3, %19, %cst {dimension_numbers = #tpu.dot_dimension_numbers<[1], [0], [0], [1], [0, 0, 1, 1], [], []>} : vector<2x8xf32>, vector<8x128xf32>, vector<2x128xf32> -> vector<2x128xf32>
    %c0_7 = arith.constant 0 : index
    %c0_8 = arith.constant 0 : index
    %21 = vector.load %arg12[%c0_7, %c0_8] : memref<1x128xf32, #tpu.memory_space<vmem>>, vector<1x128xf32>
    %22 = arith.mulf %6, %6 : vector<2x128xf32>
    %23 = arith.mulf %22, %20 : vector<2x128xf32>
    %cst_9 = arith.constant dense<0.000000e+00> : vector<128xf32>
    %24 = vector.multi_reduction <add>, %23, %cst_9 [0] : vector<2x128xf32> to vector<128xf32>
    %25 = vector.shape_cast %24 : vector<128xf32> to vector<1x128xf32>
    %26 = arith.addf %21, %25 : vector<1x128xf32>
    %c0_10 = arith.constant 0 : index
    %c0_11 = arith.constant 0 : index
    %27 = vector.load %arg12[%c0_10, %c0_11] : memref<1x128xf32, #tpu.memory_space<vmem>>, vector<1x128xf32>
    tpu.vector_store %arg12[%c0_10, %c0_11], %26 {strides = array<i32>} : memref<1x128xf32, #tpu.memory_space<vmem>>, vector<1x128xf32>,
    %c0_12 = arith.constant 0 : index
    %c0_13 = arith.constant 0 : index
    %28 = vector.load %arg13[%c0_12, %c0_13] : memref<1x8xf32, #tpu.memory_space<vmem>>, vector<1x8xf32>
    %cst_14 = arith.constant dense<0.000000e+00> : vector<8xf32>
    %29 = vector.multi_reduction <add>, %3, %cst_14 [0] : vector<2x8xf32> to vector<8xf32>
    %30 = vector.shape_cast %29 : vector<8xf32> to vector<1x8xf32>
    %31 = arith.addf %28, %30 : vector<1x8xf32>
    %c0_15 = arith.constant 0 : index
    %c0_16 = arith.constant 0 : index
    %32 = vector.load %arg13[%c0_15, %c0_16] : memref<1x8xf32, #tpu.memory_space<vmem>>, vector<1x8xf32>
    tpu.vector_store %arg13[%c0_15, %c0_16], %31 {strides = array<i32>} : memref<1x8xf32, #tpu.memory_space<vmem>>, vector<1x8xf32>,
    %c0_17 = arith.constant 0 : index
    %c0_18 = arith.constant 0 : index
    %33 = vector.load %arg5[%c0_17, %c0_18] : memref<2x64xf32, #tpu.memory_space<vmem>>, vector<2x64xf32>
    %cst_19 = arith.constant 1.000000e-07 : f32
    %34 = vector.broadcast %cst_19 : f32 to vector<2x64xf32>
    %35 = arith.addf %33, %34 : vector<2x64xf32>
    %36 = math.log %35 : vector<2x64xf32>
    %37 = arith.mulf %35, %36 : vector<2x64xf32>
    %c0_20 = arith.constant 0 : index
    %c0_21 = arith.constant 0 : index
    %38 = vector.load %arg10[%c0_20, %c0_21] : memref<2x1xf32, #tpu.memory_space<vmem>>, vector<2x1xf32>
    %39 = vector.broadcast %38 : vector<2x1xf32> to vector<2x64xf32>
    %40 = arith.mulf %37, %39 : vector<2x64xf32>
    %c0_22 = arith.constant 0 : index
    %c0_23 = arith.constant 0 : index
    %41 = vector.load %arg14[%c0_22, %c0_23] : memref<1x64xf32, #tpu.memory_space<vmem>>, vector<1x64xf32>
    %cst_24 = arith.constant dense<0.000000e+00> : vector<64xf32>
    %42 = vector.multi_reduction <add>, %40, %cst_24 [0] : vector<2x64xf32> to vector<64xf32>
    %43 = vector.shape_cast %42 : vector<64xf32> to vector<1x64xf32>
    %44 = arith.addf %41, %43 : vector<1x64xf32>
    %c0_25 = arith.constant 0 : index
    %c0_26 = arith.constant 0 : index
    %45 = vector.load %arg14[%c0_25, %c0_26] : memref<1x64xf32, #tpu.memory_space<vmem>>, vector<1x64xf32>
    tpu.vector_store %arg14[%c0_25, %c0_26], %44 {strides = array<i32>} : memref<1x64xf32, #tpu.memory_space<vmem>>, vector<1x64xf32>,
    %c0_27 = arith.constant 0 : index
    %c0_28 = arith.constant 0 : index
    %46 = vector.load %arg7[%c0_27, %c0_28] : memref<2x4xf32, #tpu.memory_space<vmem>>, vector<2x4xf32>
    %c0_29 = arith.constant 0 : index
    %c0_30 = arith.constant 0 : index
    %47 = vector.load %arg6[%c0_29, %c0_30] : memref<2x4xf32, #tpu.memory_space<vmem>>, vector<2x4xf32>
    %48 = arith.subf %46, %47 : vector<2x4xf32>
    %c0_31 = arith.constant 0 : index
    %c0_32 = arith.constant 0 : index
    %49 = vector.load %arg15[%c0_31, %c0_32] : memref<1x4xf32, #tpu.memory_space<vmem>>, vector<1x4xf32>
    %50 = arith.mulf %48, %48 : vector<2x4xf32>
    %cst_33 = arith.constant dense<0.000000e+00> : vector<4xf32>
    %51 = vector.multi_reduction <add>, %50, %cst_33 [0] : vector<2x4xf32> to vector<4xf32>
    %52 = vector.shape_cast %51 : vector<4xf32> to vector<1x4xf32>
    %53 = arith.addf %49, %52 : vector<1x4xf32>
    %c0_34 = arith.constant 0 : index
    %c0_35 = arith.constant 0 : index
    %54 = vector.load %arg15[%c0_34, %c0_35] : memref<1x4xf32, #tpu.memory_space<vmem>>, vector<1x4xf32>
    tpu.vector_store %arg15[%c0_34, %c0_35], %53 {strides = array<i32>} : memref<1x4xf32, #tpu.memory_space<vmem>>, vector<1x4xf32>,
    %c0_36 = arith.constant 0 : index
    %c0_37 = arith.constant 0 : index
    %55 = vector.load %arg8[%c0_36, %c0_37] : memref<2x32xf32, #tpu.memory_space<vmem>>, vector<2x32xf32>
    %c0_38 = arith.constant 0 : index
    %c0_39 = arith.constant 0 : index
    %56 = vector.load %arg9[%c0_38, %c0_39] : memref<2x32xf32, #tpu.memory_space<vmem>>, vector<2x32xf32>
    %c0_40 = arith.constant 0 : index
    %c0_41 = arith.constant 0 : index
    %57 = vector.load %arg16[%c0_40, %c0_41] : memref<1x32xf32, #tpu.memory_space<vmem>>, vector<1x32xf32>
    %cst_42 = arith.constant 1.000000e+00 : f32
    %58 = vector.broadcast %cst_42 : f32 to vector<2x32xf32>
    %59 = arith.addf %58, %56 : vector<2x32xf32>
    %60 = arith.mulf %55, %55 : vector<2x32xf32>
    %61 = arith.subf %59, %60 : vector<2x32xf32>
    %62 = math.exp %56 : vector<2x32xf32>
    %63 = arith.subf %61, %62 : vector<2x32xf32>
    %cst_43 = arith.constant -5.000000e-01 : f32
    %64 = vector.broadcast %cst_43 : f32 to vector<2x32xf32>
    %65 = arith.mulf %64, %63 : vector<2x32xf32>
    %cst_44 = arith.constant dense<0.000000e+00> : vector<32xf32>
    %66 = vector.multi_reduction <add>, %65, %cst_44 [0] : vector<2x32xf32> to vector<32xf32>
    %67 = vector.shape_cast %66 : vector<32xf32> to vector<1x32xf32>
    %68 = arith.addf %57, %67 : vector<1x32xf32>
    %c0_45 = arith.constant 0 : index
    %c0_46 = arith.constant 0 : index
    %69 = vector.load %arg16[%c0_45, %c0_46] : memref<1x32xf32, #tpu.memory_space<vmem>>, vector<1x32xf32>
    tpu.vector_store %arg16[%c0_45, %c0_46], %68 {strides = array<i32>} : memref<1x32xf32, #tpu.memory_space<vmem>>, vector<1x32xf32>,
    %c0_i32_47 = arith.constant 0 : i32
    %70 = arith.cmpi eq, %arg1, %c0_i32_47 : i32
    %71 = arith.extui %70 : i1 to i32
    %c0_i32_48 = arith.constant 0 : i32
    %72 = arith.cmpi ne, %71, %c0_i32_48 : i32
    scf.if %72 {
      %c0_49 = arith.constant 0 : index
      %c0_50 = arith.constant 0 : index
      %73 = vector.load %arg12[%c0_49, %c0_50] : memref<1x128xf32, #tpu.memory_space<vmem>>, vector<1x128xf32>
      %74 = vector.shape_cast %73 : vector<1x128xf32> to vector<1x1x128xf32>
      %cst_51 = arith.constant dense<0.000000e+00> : vector<1xf32>
      %75 = vector.multi_reduction <add>, %74, %cst_51 [1, 2] : vector<1x1x128xf32> to vector<1xf32>
      %76 = vector.shape_cast %75 : vector<1xf32> to vector<1x1x1xf32>
      %77 = vector.extract %76[0, 0, 0] : f32 from vector<1x1x1xf32>
      %c0_52 = arith.constant 0 : index
      %c0_53 = arith.constant 0 : index
      %78 = memref.load %arg11[%c0_52, %c0_53] : memref<1x8xf32, #tpu.memory_space<smem>>
      memref.store %77, %arg11[%c0_52, %c0_53] : memref<1x8xf32, #tpu.memory_space<smem>>
      %c0_54 = arith.constant 0 : index
      %c0_55 = arith.constant 0 : index
      %79 = vector.load %arg13[%c0_54, %c0_55] : memref<1x8xf32, #tpu.memory_space<vmem>>, vector<1x8xf32>
      %80 = vector.shape_cast %79 : vector<1x8xf32> to vector<1x1x8xf32>
      %cst_56 = arith.constant dense<0.000000e+00> : vector<1xf32>
      %81 = vector.multi_reduction <add>, %80, %cst_56 [1, 2] : vector<1x1x8xf32> to vector<1xf32>
      %82 = vector.shape_cast %81 : vector<1xf32> to vector<1x1x1xf32>
      %83 = vector.extract %82[0, 0, 0] : f32 from vector<1x1x1xf32>
      %c0_57 = arith.constant 0 : index
      %c1 = arith.constant 1 : index
      %84 = memref.load %arg11[%c0_57, %c1] : memref<1x8xf32, #tpu.memory_space<smem>>
      memref.store %83, %arg11[%c0_57, %c1] : memref<1x8xf32, #tpu.memory_space<smem>>
      %c0_58 = arith.constant 0 : index
      %c0_59 = arith.constant 0 : index
      %85 = vector.load %arg14[%c0_58, %c0_59] : memref<1x64xf32, #tpu.memory_space<vmem>>, vector<1x64xf32>
      %86 = vector.shape_cast %85 : vector<1x64xf32> to vector<1x1x64xf32>
      %cst_60 = arith.constant dense<0.000000e+00> : vector<1xf32>
      %87 = vector.multi_reduction <add>, %86, %cst_60 [1, 2] : vector<1x1x64xf32> to vector<1xf32>
      %88 = vector.shape_cast %87 : vector<1xf32> to vector<1x1x1xf32>
      %89 = vector.extract %88[0, 0, 0] : f32 from vector<1x1x1xf32>
      %c0_61 = arith.constant 0 : index
      %c2 = arith.constant 2 : index
      %90 = memref.load %arg11[%c0_61, %c2] : memref<1x8xf32, #tpu.memory_space<smem>>
      memref.store %89, %arg11[%c0_61, %c2] : memref<1x8xf32, #tpu.memory_space<smem>>
      %c0_62 = arith.constant 0 : index
      %c0_63 = arith.constant 0 : index
      %91 = vector.load %arg15[%c0_62, %c0_63] : memref<1x4xf32, #tpu.memory_space<vmem>>, vector<1x4xf32>
      %92 = vector.shape_cast %91 : vector<1x4xf32> to vector<1x1x4xf32>
      %cst_64 = arith.constant dense<0.000000e+00> : vector<1xf32>
      %93 = vector.multi_reduction <add>, %92, %cst_64 [1, 2] : vector<1x1x4xf32> to vector<1xf32>
      %94 = vector.shape_cast %93 : vector<1xf32> to vector<1x1x1xf32>
      %95 = vector.extract %94[0, 0, 0] : f32 from vector<1x1x1xf32>
      %c0_65 = arith.constant 0 : index
      %c3 = arith.constant 3 : index
      %96 = memref.load %arg11[%c0_65, %c3] : memref<1x8xf32, #tpu.memory_space<smem>>
      memref.store %95, %arg11[%c0_65, %c3] : memref<1x8xf32, #tpu.memory_space<smem>>
      %c0_66 = arith.constant 0 : index
      %c0_67 = arith.constant 0 : index
      %97 = vector.load %arg16[%c0_66, %c0_67] : memref<1x32xf32, #tpu.memory_space<vmem>>, vector<1x32xf32>
      %98 = vector.shape_cast %97 : vector<1x32xf32> to vector<1x1x32xf32>
      %cst_68 = arith.constant dense<0.000000e+00> : vector<1xf32>
      %99 = vector.multi_reduction <add>, %98, %cst_68 [1, 2] : vector<1x1x32xf32> to vector<1xf32>
      %100 = vector.shape_cast %99 : vector<1xf32> to vector<1x1x1xf32>
      %101 = vector.extract %100[0, 0, 0] : f32 from vector<1x1x1xf32>
      %c0_69 = arith.constant 0 : index
      %c4 = arith.constant 4 : index
      %102 = memref.load %arg11[%c0_69, %c4] : memref<1x8xf32, #tpu.memory_space<smem>>
      memref.store %101, %arg11[%c0_69, %c4] : memref<1x8xf32, #tpu.memory_space<smem>>
      %cst_70 = arith.constant 0.000000e+00 : f32
      %c0_71 = arith.constant 0 : index
      %c5 = arith.constant 5 : index
      %103 = memref.load %arg11[%c0_71, %c5] : memref<1x8xf32, #tpu.memory_space<smem>>
      memref.store %cst_70, %arg11[%c0_71, %c5] : memref<1x8xf32, #tpu.memory_space<smem>>
      %cst_72 = arith.constant 0.000000e+00 : f32
      %c0_73 = arith.constant 0 : index
      %c6 = arith.constant 6 : index
      %104 = memref.load %arg11[%c0_73, %c6] : memref<1x8xf32, #tpu.memory_space<smem>>
      memref.store %cst_72, %arg11[%c0_73, %c6] : memref<1x8xf32, #tpu.memory_space<smem>>
      %cst_74 = arith.constant 0.000000e+00 : f32
      %c0_75 = arith.constant 0 : index
      %c7 = arith.constant 7 : index
      %105 = memref.load %arg11[%c0_75, %c7] : memref<1x8xf32, #tpu.memory_space<smem>>
      memref.store %cst_74, %arg11[%c0_75, %c7] : memref<1x8xf32, #tpu.memory_space<smem>>
    } else {
    }
    return
  }
  func.func @transform_0(%arg0: i32, %arg1: i32) -> (i32, i32) {
    %c1_i32 = arith.constant 1 : i32
    %0 = arith.muli %arg0, %c1_i32 : i32
    %1 = arith.addi %0, %arg1 : i32
    %c0_i32 = arith.constant 0 : i32
    %c0_i32_0 = arith.constant 0 : i32
    return %1, %c0_i32 : i32, i32
  }
  func.func @transform_1(%arg0: i32, %arg1: i32) -> (i32, i32) {
    %c1_i32 = arith.constant 1 : i32
    %0 = arith.muli %arg0, %c1_i32 : i32
    %1 = arith.addi %0, %arg1 : i32
    %c0_i32 = arith.constant 0 : i32
    %c0_i32_0 = arith.constant 0 : i32
    return %1, %c0_i32 : i32, i32
  }
  func.func @transform_2(%arg0: i32, %arg1: i32) -> (i32, i32) {
    %c1_i32 = arith.constant 1 : i32
    %0 = arith.muli %arg0, %c1_i32 : i32
    %1 = arith.addi %0, %arg1 : i32
    %c0_i32 = arith.constant 0 : i32
    %c0_i32_0 = arith.constant 0 : i32
    return %1, %c0_i32 : i32, i32
  }
  func.func @transform_3(%arg0: i32, %arg1: i32) -> (i32, i32) {
    %c1_i32 = arith.constant 1 : i32
    %0 = arith.muli %arg0, %c1_i32 : i32
    %1 = arith.addi %0, %arg1 : i32
    %c0_i32 = arith.constant 0 : i32
    %c0_i32_0 = arith.constant 0 : i32
    return %1, %c0_i32 : i32, i32
  }
  func.func @transform_4(%arg0: i32, %arg1: i32) -> (i32, i32) {
    %c1_i32 = arith.constant 1 : i32
    %0 = arith.muli %arg0, %c1_i32 : i32
    %1 = arith.addi %0, %arg1 : i32
    %c0_i32 = arith.constant 0 : i32
    %c0_i32_0 = arith.constant 0 : i32
    return %1, %c0_i32 : i32, i32
  }
  func.func @transform_5(%arg0: i32, %arg1: i32) -> (i32, i32) {
    %c1_i32 = arith.constant 1 : i32
    %0 = arith.muli %arg0, %c1_i32 : i32
    %1 = arith.addi %0, %arg1 : i32
    %c0_i32 = arith.constant 0 : i32
    %c0_i32_0 = arith.constant 0 : i32
    return %1, %c0_i32 : i32, i32
  }
  func.func @transform_6(%arg0: i32, %arg1: i32) -> (i32, i32) {
    %c1_i32 = arith.constant 1 : i32
    %0 = arith.muli %arg0, %c1_i32 : i32
    %1 = arith.addi %0, %arg1 : i32
    %c0_i32 = arith.constant 0 : i32
    %c0_i32_0 = arith.constant 0 : i32
    return %1, %c0_i32 : i32, i32
  }
  func.func @transform_7(%arg0: i32, %arg1: i32) -> (i32, i32) {
    %c1_i32 = arith.constant 1 : i32
    %0 = arith.muli %arg0, %c1_i32 : i32
    %1 = arith.addi %0, %arg1 : i32
    %c0_i32 = arith.constant 0 : i32
    %c0_i32_0 = arith.constant 0 : i32
    return %1, %c0_i32 : i32, i32
  }
  func.func @transform_8(%arg0: i32, %arg1: i32) -> (i32, i32) {
    %c1_i32 = arith.constant 1 : i32
    %0 = arith.muli %arg0, %c1_i32 : i32
    %1 = arith.addi %0, %arg1 : i32
    %c0_i32 = arith.constant 0 : i32
    %c0_i32_0 = arith.constant 0 : i32
    return %1, %c0_i32 : i32, i32
  }
  func.func @transform_9(%arg0: i32, %arg1: i32) -> (i32, i32) {
    %c0_i32 = arith.constant 0 : i32
    %c0_i32_0 = arith.constant 0 : i32
    return %arg0, %c0_i32 : i32, i32
  }
}

</mosaic_0001>

<bundles_post_ra>
// kernel: tpu_custom_call.1
= control target key start
LH: loop header
LB: loop body
LE: loop exit
PB: predicated region body
PF: predicated region fallthrough
CT: control target
= control target key end

     0   :  { %14 = vsyncpa [#allocation8], 0  ;;  %s715_s0 = inlined_call_operand.vmem [shape: f32[2,8], index: 0, kind: input, shape index: {}]   ;;  %s716_s1 = inlined_call_operand.hbm [shape: f32[2,128], index: 1, kind: input, shape index: {}]   ;;  %s717_s2 = inlined_call_operand.hbm [shape: f32[2,128], index: 2, kind: input, shape index: {}]   ;;  %s718_s3 = inlined_call_operand.hbm [shape: f32[2,64], index: 3, kind: input, shape index: {}]   ;;  %s719_s4 = inlined_call_operand.vmem [shape: f32[2,4], index: 4, kind: input, shape index: {}]   ;;  %s720_s5 = inlined_call_operand.hbm [shape: f32[2,4], index: 5, kind: input, shape index: {}]   ;;  %s721_s6 = inlined_call_operand.vmem [shape: f32[2,32], index: 6, kind: input, shape index: {}]   ;;  %s722_s7 = inlined_call_operand.hbm [shape: f32[2,32], index: 7, kind: input, shape index: {}]   ;;  %s723_s8 = inlined_call_operand.vmem [shape: f32[2,1], index: 8, kind: input, shape index: {}]   ;;  %s724_s9 = inlined_call_operand.hbm [shape: f32[1,8], index: 9, kind: output, shape index: {}]  }
   0x1   :  { %15 = vsyncpa [#allocation11], 0 }
   0x2   :  { %16 = vsyncpa [#allocation14], 0  ;;  %s48_s11 = sshll.u32 %s717_s2, 4  ;;  %s49_s11 = int_to_ptr.hbm [resolvable:$true] %s48_s11 }
   0x3   :  { %17 = vsyncpa [#allocation9], 0  ;;  %s613_s12 = smov [#allocation10]   ;;  %s84_s16 = sshll.u32 %s720_s5, 4  ;;  %s85_s16 = int_to_ptr.hbm [resolvable:$true] %s84_s16 }
   0x4   :  { %s50_s13 = sshll.u32 %s613_s12, 4  ;;  %s614_s17 = smov [#allocation13]   ;;  %s51_s13 = int_to_ptr.vmem [resolvable:$true] %s50_s13 }
   0x5   :  { %53 = dma.hbm_to_vmem [thread:$0]  %s49_s11, 32, %s51_s13, [#allocation11]  }
   0x6   :  { %s86_s18 = sshll.u32 %s614_s17, 4  ;;  %s34_s21 = sshll.u32 %s716_s1, 4  ;;  %s87_s18 = int_to_ptr.vmem [resolvable:$true] %s86_s18  ;;  %s35_s21 = int_to_ptr.hbm [resolvable:$true] %s34_s21 }
   0x7   :  { %89 = dma.hbm_to_vmem [thread:$0]  %s85_s16, 32, %s87_s18, [#allocation14]  }
   0x8   :  { %s62_s23 = sshll.u32 %s718_s3, 4  ;;  %s615_s24 = smov [#allocation7]   ;;  %s63_s23 = int_to_ptr.hbm [resolvable:$true] %s62_s23 }
   0x9   :  { %s36_s25 = sshll.u32 %s615_s24, 4  ;;  %s616_s5 = smov [#allocation12]   ;;  %s37_s25 = int_to_ptr.vmem [resolvable:$true] %s36_s25 }
   0xa   :  { %39 = dma.hbm_to_vmem [thread:$0]  %s35_s21, 32, %s37_s25, [#allocation8]  }
   0xb   :  { %s64_s26 = sshll.u32 %s616_s5, 4  ;;  %s106_s29 = sshll.u32 %s722_s7, 4  ;;  %s65_s26 = int_to_ptr.vmem [resolvable:$true] %s64_s26  ;;  %s107_s29 = int_to_ptr.hbm [resolvable:$true] %s106_s29 }
   0xc   :  { %67 = dma.hbm_to_vmem [thread:$0]  %s63_s23, 32, %s65_s26, [#allocation11]  }
   0xd   :  { %s617_s1 = smov [#allocation15]  }
   0xe   :  { %s108_s30 = sshll.u32 %s617_s1, 4  ;;  %s109_s30 = int_to_ptr.vmem [resolvable:$true] %s108_s30 }
   0xf   :  { %111 = dma.hbm_to_vmem [thread:$0]  %s107_s29, 32, %s109_s30, [#allocation14]  }
  0x10   :  { %605 = dma.done.wait [#allocation8], 32  }
  0x11   :  { %606 = vsyncadd [#allocation8], 4294967264 }
  0x12   :  { %607 = dma.done.wait [#allocation11], 64  }
  0x13   :  { %608 = vsyncadd [#allocation11], 4294967232 }
  0x14   :  { %609 = dma.done.wait [#allocation14], 64  }
  0x15   :  { %610 = vsyncadd [#allocation14], 4294967232  ;;  %v206_v0 = vlaneseq  ;;  %v618_v1 = vmov 0   ;;  %v272_v7 = vld [vmem:[%s723_s8] sm:$0x3]  ;;  %vm218_vm2 = vcmask 64512  }
  0x16   :  { %468 = vset.pattern.permute.xlu0 %v618_v1  ;;  %v202_v8 = vld [vmem:[%s715_s0] sm:$0x3]  ;;  %v619_v9 = vmov 1.0   ;;  %vm256_vm4 = vcmask 58368   ;;  %v308_v14 = vld [vmem:[#allocation15] sm:$0x3] }
  0x17   :  { %v207_v2 = vshrl.u32 %v206_v0, 7  ;;  %v209_v3 = vand.u32 127, %v206_v0  ;;  %275 = vperm.xlu0 %468, %v272_v7   ;;  %v257_v10 = vsel %vm256_vm4, %v202_v8, 0.0  ;;  %v291_v15 = vld [vmem:[#allocation13] sm:$0x3]  ;;  %vm194_vm5 = vcmask 57344  }
  0x18   :  { %v258_v11 = vrot.slane %v257_v10, 4  ;;  %v292_v16 = vld [vmem:[%s719_s4] sm:$0x3]  ;;  %v313_v17 = vmul.f32 1.442695, %v308_v14  ;;  %v620_v21 = vmov 0.0  }
  0x19   :  { %v210_v4 = vmul.u32 16, %v207_v2  ;;  %v212_v5 = vadd.s32 1, %v207_v2  ;;  %v293_v19 = vsub.f32 %v291_v15, %v292_v16  ;;  %193 = vst [vmem:[#allocation2] sm:$0x1] %v620_v21  ;;  %vm296_vm6 = vcmask 25600   ;;  %s621_s4 = smov 0.0  }
  0x1a   :  { %v259_v12 = vadd.f32 %v258_v11, %v257_v10  ;;  %469 = vpow2.f32 %v313_v17  ;;  %v307_v22 = vld [vmem:[%s721_s6] sm:$0x3]  ;;  %195 = vst.msk [vmem:[#allocation3] sm:$0x1] %vm194_vm5, %v620_v21  ;;  %v310_v25 = vadd.f32 1.0, %v308_v14  ;;  %vm198_vm7 = vcmask 24576  }
  0x1b   :  { %vm211_vm0 = vcmp.ge.s32.totalorder %v209_v3, %v210_v4  ;;  %v213_v6 = vmul.u32 16, %v212_v5  ;;  %v295_v20 = vmul.f32 %v293_v19, %v293_v19  ;;  %v311_v26 = vmul.f32 %v307_v22, %v307_v22  ;;  %199 = vst.msk [vmem:[#allocation5] sm:$0x1] %vm198_vm7, %v620_v21  ;;  %v267_v34 = vld [vmem:[#allocation12] sm:$0x3]  ;;  %398 = sst [smem:[#allocation16 + $0x5]] %s621_s4 }
  0x1c   :  { %v260_v13 = vrot.slane %v259_v12, 2  ;;  %vm196_vm8 = vcmask 516096   ;;  %vm317_vm9 = vcmask 254976   ;;  %v268_v39 = vadd.f32 1e-07, %v267_v34  ;;  %400 = sst [smem:[#allocation16 + $0x6]] %s621_s4 }
  0x1d   :  { %vm214_vm1 = vcmp.lt.s32.totalorder %v209_v3, %v213_v6  ;;  %v297_v24 = vsel %vm296_vm6, %v295_v20, 0.0  ;;  %v312_v28 = vsub.f32 %v310_v25, %v311_v26  ;;  %197 = vst.msk [vmem:[#allocation4] sm:$0x1] %vm196_vm8, %v620_v21  ;;  %vm200_vm10 = vcmask 253952   ;;  %v203_v2 = vld [vmem:[#allocation10] sm:$0x3] }
  0x1e   :  { %vm215_vm3 = vmand %vm211_vm0, %vm214_vm1  ;;  %v261_v18 = vadd.f32 %v260_v13, %v259_v12  ;;  %v298_v27 = vrot.slane %v297_v24, 4  ;;  %471 = vlog2.f32 %v268_v39  ;;  %201 = vst.msk [vmem:[#allocation6] sm:$0x1] %vm200_vm10, %v620_v21  ;;  %vm280_vm11 = vcmask 517120   ;;  %v204_v3 = vld [vmem:[#allocation7] sm:$0x3] }
  0x1f   :  { %446 = vmatpush.msk.msra.mxu0 %vm215_vm3, %v619_v9  ;;  %v205_v5 = vsub.f32 %v203_v2, %v204_v3  ;;  %vm245_vm12 = vcmask 1041408   ;;  %vm332_vm13 = vcmask 1040384   ;;  %402 = sst [smem:[#allocation16 + $0x7]] %s621_s4  ;;  %s408_s15 = sshll.u32 %s724_s9, 4  ;;  %s409_s15 = int_to_ptr.hbm [resolvable:$true] %s408_s15 }
  0x20   :  { %447 = vmatmul.msk.f32.vlgmr.msra.gmra.mxu0 %vm218_vm2, %v202_v8  ;;  %v262_v23 = vrot.slane %v261_v18, 1  ;;  %v470_v29 = vpop.eup %469  ;;  %v299_v30 = vadd.f32 %v298_v27, %v297_v24  ;;  %s622_s21 = smov [#allocation16]  }
  0x21   :  { %v315_v32 = vsub.f32 %v312_v28, %v470_v29  ;;  %v255_v36 = vld [vmem:[#allocation3] sm:$0x1]  ;;  %v243_v8 = vmul.f32 %v205_v5, %v205_v5 }
  0x22   :  { %v263_v31 = vadd.f32 %v262_v23, %v261_v18  ;;  %v300_v33 = vrot.slane %v299_v30, 2  ;;  %v294_v44 = vld [vmem:[#allocation5] sm:$0x1]  ;;  %v242_v23 = vld [vmem:[#allocation2] sm:$0x1] }
  0x23   :  { %v316_v35 = vmul.f32 -0.5, %v315_v32 }
  0x24   :  { %v301_v37 = vadd.f32 %v300_v33, %v299_v30  ;;  %v264_v38 = vadd.f32 %v263_v31, %v255_v36  ;;  %v472_v52 = vpop.eup %471  ;;  %v279_v10 = vld [vmem:[#allocation4] sm:$0x1] }
  0x25   :  { %v318_v41 = vsel %vm317_vm9, %v316_v35, 0.0  ;;  %v309_v53 = vld [vmem:[#allocation6] sm:$0x1]  ;;  %v270_v55 = vmul.f32 0.6931472, %v472_v52 }
  0x26   :  { %v302_v40 = vrot.slane %v301_v37, 1  ;;  %266 = vst.msk [vmem:[#allocation3] sm:$0x1] %vm194_vm5, %v264_v38  ;;  %v319_v42 = vrot.slane %v318_v41, 4 }
  0x27   :  { %v271_v59 = vmul.f32 %v270_v55, %v268_v39 }
  0x28   :  { %v303_v43 = vadd.f32 %v302_v40, %v301_v37  ;;  %v320_v45 = vadd.f32 %v319_v42, %v318_v41 }
  0x2a   :  { %v304_v46 = vadd.f32 %v303_v43, %v294_v44  ;;  %v321_v47 = vrot.slane %v320_v45, 2 }
  0x2c   :  { %306 = vst.msk [vmem:[#allocation5] sm:$0x1] %vm198_vm7, %v304_v46  ;;  %v322_v48 = vadd.f32 %v321_v47, %v320_v45 }
  0x2d   :  { %v345_v49 = vld [vmem:[#allocation3] sm:$0x1] }
  0x2e   :  { %v346_v50 = vsel %vm194_vm5, %v345_v49, 0.0  ;;  %v323_v51 = vrot.slane %v322_v48, 1 }
  0x2f   :  { %347 = vadd.xlane.f32.xlu1 %v346_v50 }
  0x30   :  { %v324_v54 = vadd.f32 %v323_v51, %v322_v48 }
  0x32   :  { %v325_v57 = vadd.f32 %v324_v54, %v309_v53 }
  0x33   :  { %v371_v56 = vld [vmem:[#allocation5] sm:$0x1] }
  0x34   :  { %v372_v58 = vsel %vm198_vm7, %v371_v56, 0.0  ;;  %327 = vst.msk [vmem:[#allocation6] sm:$0x1] %vm200_vm10, %v325_v57 }
  0x35   :  { %373 = vadd.xlane.f32.xlu2 %v372_v58 }
  0x3b   :  { %v384_v62 = vld [vmem:[#allocation6] sm:$0x1] }
  0x3c   :  { %v385_v0 = vsel %vm200_vm10, %v384_v62, 0.0 }
  0x3d   :  { %386 = vadd.xlane.f32.xlu2 %v385_v0 }
  0x89   :  { %v276_v60 = vpop.permute.xlu0 %275 }
  0x8a   :  { %v278_v61 = vmul.f32 %v276_v60, %v271_v59 }
  0x8c   :  { %v281_v63 = vsel %vm280_vm11, %v278_v61, 0.0 }
  0x8d   :  { %v282_v1 = vrot.slane %v281_v63, 4 }
  0x8f   :  { %v283_v4 = vadd.f32 %v282_v1, %v281_v63 }
  0x91   :  { %v284_v6 = vrot.slane %v283_v4, 2 }
  0x93   :  { %v285_v7 = vadd.f32 %v284_v6, %v283_v4 }
  0x95   :  { %v286_v9 = vrot.slane %v285_v7, 1 }
  0x97   :  { %v287_v11 = vadd.f32 %v286_v9, %v285_v7 }
  0x99   :  { %v288_v14 = vadd.f32 %v287_v11, %v279_v10 }
  0x9b   :  { %290 = vst.msk [vmem:[#allocation4] sm:$0x1] %vm196_vm8, %v288_v14 }
  0x9d   :  { %v239_v12 = vpop.f32.mrf.mxu0 }
  0x9e   :  { %v244_v13 = vmul.f32 %v243_v8, %v239_v12 }
  0xa0   :  { %v246_v15 = vsel %vm245_vm12, %v244_v13, 0.0 }
  0xa1   :  { %v247_v16 = vrot.slane %v246_v15, 4 }
  0xa2   :  { %v358_v20 = vld [vmem:[#allocation4] sm:$0x1]  ;;  %v348_v28 = vpop.xlane.xlu1 %347 }
  0xa3   :  { %v248_v17 = vadd.f32 %v247_v16, %v246_v15  ;;  %v359_v22 = vsel %vm196_vm8, %v358_v20, 0.0  ;;  %v349_v31 = vrot.slane %v348_v28, 4 }
  0xa4   :  { %360 = vadd.xlane.f32.xlu1 %v359_v22 }
  0xa5   :  { %v249_v18 = vrot.slane %v248_v17, 2  ;;  %v350_v36 = vadd.f32 %v349_v31, %v348_v28 }
  0xa7   :  { %v250_v19 = vadd.f32 %v249_v18, %v248_v17  ;;  %v351_v40 = vrot.slane %v350_v36, 2 }
  0xa8   :  { %v374_v29 = vpop.xlane.xlu2 %373 }
  0xa9   :  { %v251_v21 = vrot.slane %v250_v19, 1  ;;  %v375_v34 = vrot.slane %v374_v29, 4  ;;  %v352_v47 = vadd.f32 %v351_v40, %v350_v36 }
  0xab   :  { %v252_v24 = vadd.f32 %v251_v21, %v250_v19  ;;  %v376_v38 = vadd.f32 %v375_v34, %v374_v29  ;;  %v353_v53 = vrot.slane %v352_v47, 1 }
  0xad   :  { %v253_v25 = vadd.f32 %v252_v24, %v242_v23  ;;  %v377_v44 = vrot.slane %v376_v38, 2  ;;  %v354_v59 = vadd.f32 %v353_v53, %v352_v47 }
  0xaf   :  { %254 = vst [vmem:[#allocation2] sm:$0x1] %v253_v25  ;;  %v378_v50 = vadd.f32 %v377_v44, %v376_v38 }
  0xb0   :  { %v387_v32 = vpop.xlane.xlu2 %386 }
  0xb1   :  { %v388_v35 = vrot.slane %v387_v32, 4  ;;  %v379_v56 = vrot.slane %v378_v50, 1 }
  0xb3   :  { %v389_v39 = vadd.f32 %v388_v35, %v387_v32  ;;  %v380_v61 = vadd.f32 %v379_v56, %v378_v50 }
  0xb5   :  { %v390_v45 = vrot.slane %v389_v39, 2 }
  0xb6   :  { %v331_v26 = vld [vmem:[#allocation2] sm:$0x1] }
  0xb7   :  { %v333_v27 = vsel %vm332_vm13, %v331_v26, 0.0  ;;  %v391_v51 = vadd.f32 %v390_v45, %v389_v39 }
  0xb8   :  { %334 = vadd.xlane.f32.xlu0 %v333_v27 }
  0xb9   :  { %v392_v58 = vrot.slane %v391_v51, 1 }
  0xbb   :  { %v393_v62 = vadd.f32 %v392_v58, %v391_v51 }
 0x117   :  { %v361_v30 = vpop.xlane.xlu1 %360 }
 0x118   :  { %v362_v33 = vrot.slane %v361_v30, 4 }
 0x11a   :  { %v363_v37 = vadd.f32 %v362_v33, %v361_v30 }
 0x11c   :  { %v364_v42 = vrot.slane %v363_v37, 2 }
 0x11e   :  { %v365_v48 = vadd.f32 %v364_v42, %v363_v37 }
 0x120   :  { %v366_v55 = vrot.slane %v365_v48, 1 }
 0x122   :  { %v367_v60 = vadd.f32 %v366_v55, %v365_v48 }
 0x12b   :  { %v335_v41 = vpop.xlane.xlu0 %334 }
 0x12c   :  { %v336_v43 = vrot.slane %v335_v41, 4 }
 0x12e   :  { %v337_v46 = vadd.f32 %v336_v43, %v335_v41 }
 0x130   :  { %v338_v49 = vrot.slane %v337_v46, 2 }
 0x132   :  { %v339_v52 = vadd.f32 %v338_v49, %v337_v46 }
 0x134   :  { %v340_v54 = vrot.slane %v339_v52, 1 }
 0x136   :  { %v341_v57 = vadd.f32 %v340_v54, %v339_v52 }
 0x138   :  { %448 = vpush %v341_v57 }
 0x139   :  { %450 = vpush %v354_v59 }
 0x13a   :  { %452 = vpush %v367_v60 }
 0x13b   :  { %454 = vpush %v380_v61 }
 0x13c   :  { %456 = vpush %v393_v62 }
 0x169   :  { %s449_s16 = spop %448 }
 0x16a   :  { %344 = sst [smem:[#allocation16]] %s449_s16  ;;  %s451_s17 = spop %450 }
 0x16b   :  { %357 = sst [smem:[#allocation16 + $0x1]] %s451_s17  ;;  %s453_s18 = spop %452 }
 0x16c   :  { %370 = sst [smem:[#allocation16 + $0x2]] %s453_s18  ;;  %s455_s19 = spop %454 }
 0x16d   :  { %383 = sst [smem:[#allocation16 + $0x3]] %s455_s19  ;;  %s457_s20 = spop %456 }
 0x16e   :  { %396 = sst [smem:[#allocation16 + $0x4]] %s457_s20 }
 0x16f   :  { %411 = dma.smem_to_hbm %s622_s21, 16, %s409_s15, [#allocation9]  }
 0x170   :  { %611 = dma.done.wait [#allocation9], 16  }
 0x171   :  { %612 = vsyncadd [#allocation9], 4294967280 }
 0x172   :  { %416 = sfence }
 0x173   :  { %417 = vsyncpa [#allocation8], 1 }
 0x174   :  { %418 = vsyncpa [#allocation11], 1 }
 0x175   :  { %419 = vsyncpa [#allocation14], 1 }
 0x176   :  { %420 = vsyncpa [#allocation9], 1 }

</bundles_post_ra>
